<compile_context>
chip_gen: v5e
topology: v5e:2x2
jax: 0.10.0
libtpu: 0.0.40
codegen_flags: <defaults>
</compile_context>

<pallas_src>
import functools

import jax
import jax.numpy as jnp
from jax.experimental import pallas as pl
from jax.experimental.pallas import tpu as pltpu


def _pad_to(n, m):
    return ((n + m - 1) // m) * m


# ------------------------------ Pallas kernels --------------------------------

def fused_gcn_kernel(aT_ref, xT_ref, w1_ref, b1_ref, w2_ref, b2_ref,
                     w3_ref, b3_ref, w4_ref, b4_ref, poolT_ref, outT_ref):
    """All 4 GCN layers + mean pool with A_hat^T resident in VMEM (bf16)."""
    a = aT_ref[...]                         # bf16 [N, N], resident, read once
    h = xT_ref[...]                         # f32  [d_in, N]

    def layer(h, w_ref, b_ref, relu):
        # (W^T @ H^T) @ A_hat^T == (A_hat @ (H @ W))^T ; bf16 MXU, f32 accumulation.
        hw = jnp.dot(w_ref[...].astype(jnp.bfloat16), h.astype(jnp.bfloat16),
                     preferred_element_type=jnp.float32)
        out = jnp.dot(hw.astype(jnp.bfloat16), a,
                      preferred_element_type=jnp.float32) + b_ref[...]
        return jnp.maximum(out, 0.0) if relu else out

    h = layer(h, w1_ref, b1_ref, True)
    h = layer(h, w2_ref, b2_ref, True)
    h = layer(h, w3_ref, b3_ref, True)
    h = layer(h, w4_ref, b4_ref, False)
    # global mean pool: out^T = H_last^T @ P^T  (tiny single store)
    outT_ref[...] = jnp.dot(h, poolT_ref[...], preferred_element_type=jnp.float32)


def project_kernel(hT_ref, wT_ref, out_ref):
    """HW^T tile = W^T @ H^T tile (bf16 MXU, f32 accumulate, bf16 store)."""
    out_ref[...] = jnp.dot(
        wT_ref[...].astype(jnp.bfloat16), hT_ref[...].astype(jnp.bfloat16),
        preferred_element_type=jnp.float32).astype(jnp.bfloat16)


def aggregate_kernel(hwT_ref, a_ref, b_ref, out_ref, *, relu):
    """out^T[:, j] = sum_k HW^T[:, k] @ A_hat^T[k, j] + b  (+ ReLU).

    grid = (target tiles j [parallel], source tiles k [arbitrary, reduction]).
    The output block index is constant over k, so out_ref is the resident f32
    accumulator (no scratch, no final copy).
    """
    k = pl.program_id(1)

    @pl.when(k == 0)
    def _():
        out_ref[...] = jnp.zeros_like(out_ref)

    out_ref[...] += jnp.dot(hwT_ref[...], a_ref[...],
                            preferred_element_type=jnp.float32)

    @pl.when(k == pl.num_programs(1) - 1)
    def _():
        r = out_ref[...] + b_ref[...]            # bias broadcast across lanes
        if relu:
            r = jnp.maximum(r, 0.0)
        out_ref[...] = r


def mean_pool_kernel(hT_ref, poolT_ref, out_ref):
    """out^T = H_last^T @ P^T, reduced over node tiles (grid axis 0)."""
    k = pl.program_id(0)

    @pl.when(k == 0)
    def _():
        out_ref[...] = jnp.zeros_like(out_ref)

    out_ref[...] += jnp.dot(hT_ref[...], poolT_ref[...],
                            preferred_element_type=jnp.float32)


# ------------------------------ Pallas wrappers --------------------------------

def fused_gcn_forward(a_hat, x, params, pool):
    """Single pallas_call; A_hat^T resident in VMEM. For n_pad <= ~2048."""
    n, d_in = x.shape
    g = pool.shape[0]
    n_cls = params[-1][0].shape[1]
    n_pad = max(128, _pad_to(n, 128))

    a_p = (jnp.zeros((n_pad, n_pad), jnp.float32)
           .at[:n, :n].set(a_hat.T).astype(jnp.bfloat16))
    xT = jnp.zeros((d_in, n_pad), jnp.float32).at[:, :n].set(x.T)
    poolT = jnp.zeros((n_pad, g), jnp.float32).at[:n, :].set(pool.T)

    (w1, b1), (w2, b2), (w3, b3), (w4, b4) = params
    outT = pl.pallas_call(
        fused_gcn_kernel,
        out_shape=jax.ShapeDtypeStruct((n_cls, g), jnp.float32),
        compiler_params=pltpu.CompilerParams(vmem_limit_bytes=32 * 1024 * 1024),
    )(a_p, xT, w1.T, b1.T, w2.T, b2.T, w3.T, b3.T, w4.T, b4.T, poolT)
    return outT.T                                  # [G, n_classes]


def project(hT, wT, *, tile_n):
    """HW^T = W^T @ H^T, tiled over the node (lane) axis."""
    d_out, d_in = wT.shape
    n_pad = hT.shape[1]
    return pl.pallas_call(
        project_kernel,
        out_shape=jax.ShapeDtypeStruct((d_out, n_pad), jnp.bfloat16),
        grid_spec=pltpu.PrefetchScalarGridSpec(
            num_scalar_prefetch=0,
            grid=(n_pad // tile_n,),
            in_specs=[
                pl.BlockSpec((d_in, tile_n), lambda j: (0, j)),   # H^T tile
                pl.BlockSpec((d_out, d_in), lambda j: (0, 0)),    # W^T (resident)
            ],
            out_specs=pl.BlockSpec((d_out, tile_n), lambda j: (0, j)),
        ),
        compiler_params=pltpu.CompilerParams(
            dimension_semantics=("parallel",)),
    )(hT, wT)


def aggregate(hwT, a_bf16, b_col, relu, *, tile_j, tile_k):
    """out^T = HW^T @ A_hat^T + b (+ ReLU), streaming A_hat in big bf16 tiles."""
    d_out = hwT.shape[0]
    n_pad = a_bf16.shape[0]
    grid = (n_pad // tile_j, n_pad // tile_k)      # (target tiles, source tiles)
    return pl.pallas_call(
        functools.partial(aggregate_kernel, relu=relu),
        out_shape=jax.ShapeDtypeStruct((d_out, n_pad), jnp.float32),
        grid_spec=pltpu.PrefetchScalarGridSpec(
            num_scalar_prefetch=0,
            grid=grid,
            in_specs=[
                pl.BlockSpec((d_out, tile_k), lambda j, k: (0, k)),   # HW^T (bf16)
                pl.BlockSpec((tile_k, tile_j), lambda j, k: (k, j)),  # A_hat^T (bf16)
                pl.BlockSpec((d_out, 1), lambda j, k: (0, 0)),        # bias (resident)
            ],
            out_specs=pl.BlockSpec((d_out, tile_j), lambda j, k: (0, j)),
        ),
        compiler_params=pltpu.CompilerParams(
            dimension_semantics=("parallel", "arbitrary")),
    )(hwT, a_bf16, b_col)


def mean_pool(h_lastT, poolT, *, tile_n):
    n_cls, n_pad = h_lastT.shape
    g = poolT.shape[1]
    outT = pl.pallas_call(
        mean_pool_kernel,
        out_shape=jax.ShapeDtypeStruct((n_cls, g), jnp.float32),
        grid_spec=pltpu.PrefetchScalarGridSpec(
            num_scalar_prefetch=0,
            grid=(n_pad // tile_n,),
            in_specs=[
                pl.BlockSpec((n_cls, tile_n), lambda k: (0, k)),
                pl.BlockSpec((tile_n, g), lambda k: (k, 0)),
            ],
            out_specs=pl.BlockSpec((n_cls, g), lambda k: (0, 0)),
        ),
        compiler_params=pltpu.CompilerParams(
            dimension_semantics=("arbitrary",)),
    )(h_lastT, poolT)
    return outT.T                                  # [G, n_classes]


def tiled_gcn_forward(a_hat, x, params, pool, *, tile_j=512, tile_k=256):
    """Streaming path for graphs too large to hold A_hat resident in VMEM."""
    assert tile_j % 128 == 0 and tile_k % 128 == 0 and tile_j % tile_k == 0
    n, d_in = x.shape
    g = pool.shape[0]
    n_pad = _pad_to(n, tile_j)

    # Lane-dense transposed + zero-padded layout.  Padded nodes: zero A rows/
    # cols and zero pool weight => they never contribute (see invariant above).
    a_p = (jnp.zeros((n_pad, n_pad), jnp.float32)
           .at[:n, :n].set(a_hat.T).astype(jnp.bfloat16))
    hT = jnp.zeros((d_in, n_pad), jnp.float32).at[:, :n].set(x.T)
    poolT = jnp.zeros((n_pad, g), jnp.float32).at[:n, :].set(pool.T)

    n_layers = len(params)
    for i, (w, b) in enumerate(params):
        hwT = project(hT, w.T, tile_n=tile_j)                       # bf16 [d_out, N]
        hT = aggregate(hwT, a_p, b.T, relu=(i < n_layers - 1),
                       tile_j=tile_j, tile_k=tile_k)                # f32 [d_out, N]
    # TODO(synk): fuse the pool into the last aggregate's k==last epilogue to
    # avoid one HBM round-trip of H_last^T.
    return mean_pool(hT, poolT, tile_n=tile_j)


def simple_gcn_forward(a_hat, x, params, pool, *, fused_max_nodes=2048,
                       tile_j=512, tile_k=256):
    """SimpleGCN forward: 3x(GCNConv + ReLU) + GCNConv + global_mean_pool."""
    n = x.shape[0]
    if max(128, _pad_to(n, 128)) <= fused_max_nodes:
        return fused_gcn_forward(a_hat, x, params, pool)
    return tiled_gcn_forward(a_hat, x, params, pool, tile_j=tile_j, tile_k=tile_k)


# ----------------------------- plain-JAX glue --------------------------------

def build_norm_adj(edge_index, num_nodes):
    """Dense symmetric-normalized adjacency with self-loops (PyG gcn_norm)."""
    src, dst = edge_index[0], edge_index[1]
    loop = jnp.arange(num_nodes, dtype=src.dtype)
    src = jnp.concatenate([src, loop])
    dst = jnp.concatenate([dst, loop])
    a = jnp.zeros((num_nodes, num_nodes), jnp.float32).at[dst, src].add(1.0)
    deg = a.sum(axis=1)                              # in-degree incl. self-loop
    dinv = jnp.where(deg > 0, 1.0 / jnp.sqrt(deg), 0.0)
    return dinv[:, None] * a * dinv[None, :]         # D^-1/2 (A+I) D^-1/2


def build_mean_pool(batch, num_graphs):
    """P[g, i] = 1/count_g if batch[i] == g else 0."""
    onehot = (batch[None, :] == jnp.arange(num_graphs)[:, None]).astype(jnp.float32)
    counts = onehot.sum(axis=1, keepdims=True)
    return onehot / jnp.maximum(counts, 1.0)


def glorot(key, shape):
    fan_in, fan_out = shape
    limit = (6.0 / (fan_in + fan_out)) ** 0.5
    return jax.random.uniform(key, shape, jnp.float32, -limit, limit)


def init_params(key, in_dim, hidden_dim, n_classes):
    """Weights stored as [in, out]; biases as [1, out]."""
    ks = jax.random.split(key, 8)
    dims = [(in_dim, hidden_dim), (hidden_dim, hidden_dim),
            (hidden_dim, hidden_dim), (hidden_dim, n_classes)]
    params = []
    for i, d in enumerate(dims):
        w = glorot(ks[2 * i], d)
        b = 0.1 * jax.random.normal(ks[2 * i + 1], (1, d[1]), jnp.float32)
        params.append((w, b))
    return params


def ring_edges(offset, n):
    s = jnp.arange(n, dtype=jnp.int32) + offset
    d = (jnp.arange(n, dtype=jnp.int32) + 1) % n + offset
    return jnp.stack([jnp.concatenate([s, d]), jnp.concatenate([d, s])])


if __name__ == "__main__":
    key = jax.random.PRNGKey(0)

    # 2 ring graphs of 100 nodes each -> N=200.
    N = 200
    in_dim = 16
    hidden_dim = 32
    out_dim = 32      # unused by the forward pass (matches the PyTorch module)
    n_classes = 8
    num_graphs = 2

    k_x, k_p = jax.random.split(key, 2)
    x = jax.random.normal(k_x, (N, in_dim), jnp.float32)

    e0 = ring_edges(0, 100)
    e1 = ring_edges(100, 100)
    edge_index = jnp.concatenate([e0, e1], axis=1)          # [2, 400]
    batch = jnp.concatenate([jnp.zeros(100, jnp.int32), jnp.ones(100, jnp.int32)])

    a_hat = build_norm_adj(edge_index, N)                    # [N, N]
    pool = build_mean_pool(batch, num_graphs)                # [G, N]
    params = init_params(k_p, in_dim, hidden_dim, n_classes)

    # Dispatcher picks the fused (A_hat-resident) path at this size.
    out_fused = jax.block_until_ready(simple_gcn_forward(a_hat, x, params, pool))
    # Explicitly exercise the streaming/tiled path used for large graphs.
    out_tiled = jax.block_until_ready(
        tiled_gcn_forward(a_hat, x, params, pool, tile_j=512, tile_k=256))

    # Pure-JAX f32 reference (tolerance loosened: A_hat and H@W go through the
    # MXU in bf16).
    h = x
    for i, (w, b) in enumerate(params):
        h = a_hat @ (h @ w) + b
        if i < 3:
            h = jnp.maximum(h, 0.0)
    ref = pool @ h

    assert out_fused.shape == (num_graphs, n_classes)
    assert out_tiled.shape == (num_graphs, n_classes)
    assert jnp.allclose(out_fused, ref, atol=5e-2, rtol=5e-2)
    assert jnp.allclose(out_tiled, ref, atol=5e-2, rtol=5e-2)

    print("KERNEL_OK")
</pallas_src>

<mosaic_0001>
module attributes {stable_mosaic.version = 11 : i64} {
  func.func @fused_gcn_kernel(%arg0: memref<256x256xbf16, #tpu.memory_space<vmem>>, %arg1: memref<16x256xf32, #tpu.memory_space<vmem>>, %arg2: memref<32x16xf32, #tpu.memory_space<vmem>>, %arg3: memref<32x1xf32, #tpu.memory_space<vmem>>, %arg4: memref<32x32xf32, #tpu.memory_space<vmem>>, %arg5: memref<32x1xf32, #tpu.memory_space<vmem>>, %arg6: memref<32x32xf32, #tpu.memory_space<vmem>>, %arg7: memref<32x1xf32, #tpu.memory_space<vmem>>, %arg8: memref<8x32xf32, #tpu.memory_space<vmem>>, %arg9: memref<8x1xf32, #tpu.memory_space<vmem>>, %arg10: memref<256x2xf32, #tpu.memory_space<vmem>>, %arg11: memref<8x2xf32, #tpu.memory_space<vmem>>) attributes {dimension_semantics = [], scalar_prefetch = 0 : i64, scratch_operands = 0 : i64, tpu.core_type = #tpu.core_type<tc>} {
    %c0 = arith.constant 0 : index
    %c0_0 = arith.constant 0 : index
    %0 = vector.load %arg0[%c0, %c0_0] : memref<256x256xbf16, #tpu.memory_space<vmem>>, vector<256x256xbf16>
    %c0_1 = arith.constant 0 : index
    %c0_2 = arith.constant 0 : index
    %1 = vector.load %arg1[%c0_1, %c0_2] : memref<16x256xf32, #tpu.memory_space<vmem>>, vector<16x256xf32>
    %c0_3 = arith.constant 0 : index
    %c0_4 = arith.constant 0 : index
    %2 = vector.load %arg2[%c0_3, %c0_4] : memref<32x16xf32, #tpu.memory_space<vmem>>, vector<32x16xf32>
    %3 = arith.truncf %2 : vector<32x16xf32> to vector<32x16xbf16>
    %4 = arith.truncf %1 : vector<16x256xf32> to vector<16x256xbf16>
    %cst = arith.constant dense<0.000000e+00> : vector<32x256xf32>
    %5 = tpu.matmul %3, %4, %cst {dimension_numbers = #tpu.dot_dimension_numbers<[1], [0], [0], [1], [0, 0, 1, 1], [], []>} : vector<32x16xbf16>, vector<16x256xbf16>, vector<32x256xf32> -> vector<32x256xf32>
    %6 = arith.truncf %5 : vector<32x256xf32> to vector<32x256xbf16>
    %cst_5 = arith.constant dense<0.000000e+00> : vector<32x256xf32>
    %7 = tpu.matmul %6, %0, %cst_5 {dimension_numbers = #tpu.dot_dimension_numbers<[1], [0], [0], [1], [0, 0, 1, 1], [], []>} : vector<32x256xbf16>, vector<256x256xbf16>, vector<32x256xf32> -> vector<32x256xf32>
    %c0_6 = arith.constant 0 : index
    %c0_7 = arith.constant 0 : index
    %8 = vector.load %arg3[%c0_6, %c0_7] : memref<32x1xf32, #tpu.memory_space<vmem>>, vector<32x1xf32>
    %9 = vector.broadcast %8 : vector<32x1xf32> to vector<32x256xf32>
    %10 = arith.addf %7, %9 : vector<32x256xf32>
    %cst_8 = arith.constant 0.000000e+00 : f32
    %11 = vector.broadcast %cst_8 : f32 to vector<32x256xf32>
    %12 = arith.maximumf %10, %11 : vector<32x256xf32>
    %c0_9 = arith.constant 0 : index
    %c0_10 = arith.constant 0 : index
    %13 = vector.load %arg4[%c0_9, %c0_10] : memref<32x32xf32, #tpu.memory_space<vmem>>, vector<32x32xf32>
    %14 = arith.truncf %13 : vector<32x32xf32> to vector<32x32xbf16>
    %15 = arith.truncf %12 : vector<32x256xf32> to vector<32x256xbf16>
    %cst_11 = arith.constant dense<0.000000e+00> : vector<32x256xf32>
    %16 = tpu.matmul %14, %15, %cst_11 {dimension_numbers = #tpu.dot_dimension_numbers<[1], [0], [0], [1], [0, 0, 1, 1], [], []>} : vector<32x32xbf16>, vector<32x256xbf16>, vector<32x256xf32> -> vector<32x256xf32>
    %17 = arith.truncf %16 : vector<32x256xf32> to vector<32x256xbf16>
    %cst_12 = arith.constant dense<0.000000e+00> : vector<32x256xf32>
    %18 = tpu.matmul %17, %0, %cst_12 {dimension_numbers = #tpu.dot_dimension_numbers<[1], [0], [0], [1], [0, 0, 1, 1], [], []>} : vector<32x256xbf16>, vector<256x256xbf16>, vector<32x256xf32> -> vector<32x256xf32>
    %c0_13 = arith.constant 0 : index
    %c0_14 = arith.constant 0 : index
    %19 = vector.load %arg5[%c0_13, %c0_14] : memref<32x1xf32, #tpu.memory_space<vmem>>, vector<32x1xf32>
    %20 = vector.broadcast %19 : vector<32x1xf32> to vector<32x256xf32>
    %21 = arith.addf %18, %20 : vector<32x256xf32>
    %cst_15 = arith.constant 0.000000e+00 : f32
    %22 = vector.broadcast %cst_15 : f32 to vector<32x256xf32>
    %23 = arith.maximumf %21, %22 : vector<32x256xf32>
    %c0_16 = arith.constant 0 : index
    %c0_17 = arith.constant 0 : index
    %24 = vector.load %arg6[%c0_16, %c0_17] : memref<32x32xf32, #tpu.memory_space<vmem>>, vector<32x32xf32>
    %25 = arith.truncf %24 : vector<32x32xf32> to vector<32x32xbf16>
    %26 = arith.truncf %23 : vector<32x256xf32> to vector<32x256xbf16>
    %cst_18 = arith.constant dense<0.000000e+00> : vector<32x256xf32>
    %27 = tpu.matmul %25, %26, %cst_18 {dimension_numbers = #tpu.dot_dimension_numbers<[1], [0], [0], [1], [0, 0, 1, 1], [], []>} : vector<32x32xbf16>, vector<32x256xbf16>, vector<32x256xf32> -> vector<32x256xf32>
    %28 = arith.truncf %27 : vector<32x256xf32> to vector<32x256xbf16>
    %cst_19 = arith.constant dense<0.000000e+00> : vector<32x256xf32>
    %29 = tpu.matmul %28, %0, %cst_19 {dimension_numbers = #tpu.dot_dimension_numbers<[1], [0], [0], [1], [0, 0, 1, 1], [], []>} : vector<32x256xbf16>, vector<256x256xbf16>, vector<32x256xf32> -> vector<32x256xf32>
    %c0_20 = arith.constant 0 : index
    %c0_21 = arith.constant 0 : index
    %30 = vector.load %arg7[%c0_20, %c0_21] : memref<32x1xf32, #tpu.memory_space<vmem>>, vector<32x1xf32>
    %31 = vector.broadcast %30 : vector<32x1xf32> to vector<32x256xf32>
    %32 = arith.addf %29, %31 : vector<32x256xf32>
    %cst_22 = arith.constant 0.000000e+00 : f32
    %33 = vector.broadcast %cst_22 : f32 to vector<32x256xf32>
    %34 = arith.maximumf %32, %33 : vector<32x256xf32>
    %c0_23 = arith.constant 0 : index
    %c0_24 = arith.constant 0 : index
    %35 = vector.load %arg8[%c0_23, %c0_24] : memref<8x32xf32, #tpu.memory_space<vmem>>, vector<8x32xf32>
    %36 = arith.truncf %35 : vector<8x32xf32> to vector<8x32xbf16>
    %37 = arith.truncf %34 : vector<32x256xf32> to vector<32x256xbf16>
    %cst_25 = arith.constant dense<0.000000e+00> : vector<8x256xf32>
    %38 = tpu.matmul %36, %37, %cst_25 {dimension_numbers = #tpu.dot_dimension_numbers<[1], [0], [0], [1], [0, 0, 1, 1], [], []>} : vector<8x32xbf16>, vector<32x256xbf16>, vector<8x256xf32> -> vector<8x256xf32>
    %39 = arith.truncf %38 : vector<8x256xf32> to vector<8x256xbf16>
    %cst_26 = arith.constant dense<0.000000e+00> : vector<8x256xf32>
    %40 = tpu.matmul %39, %0, %cst_26 {dimension_numbers = #tpu.dot_dimension_numbers<[1], [0], [0], [1], [0, 0, 1, 1], [], []>} : vector<8x256xbf16>, vector<256x256xbf16>, vector<8x256xf32> -> vector<8x256xf32>
    %c0_27 = arith.constant 0 : index
    %c0_28 = arith.constant 0 : index
    %41 = vector.load %arg9[%c0_27, %c0_28] : memref<8x1xf32, #tpu.memory_space<vmem>>, vector<8x1xf32>
    %42 = vector.broadcast %41 : vector<8x1xf32> to vector<8x256xf32>
    %43 = arith.addf %40, %42 : vector<8x256xf32>
    %c0_29 = arith.constant 0 : index
    %c0_30 = arith.constant 0 : index
    %44 = vector.load %arg10[%c0_29, %c0_30] : memref<256x2xf32, #tpu.memory_space<vmem>>, vector<256x2xf32>
    %cst_31 = arith.constant dense<0.000000e+00> : vector<8x2xf32>
    %45 = tpu.matmul %43, %44, %cst_31 {dimension_numbers = #tpu.dot_dimension_numbers<[1], [0], [0], [1], [0, 0, 1, 1], [], []>} : vector<8x256xf32>, vector<256x2xf32>, vector<8x2xf32> -> vector<8x2xf32>
    %c0_32 = arith.constant 0 : index
    %c0_33 = arith.constant 0 : index
    %46 = vector.load %arg11[%c0_32, %c0_33] : memref<8x2xf32, #tpu.memory_space<vmem>>, vector<8x2xf32>
    tpu.vector_store %arg11[%c0_32, %c0_33], %45 {strides = array<i32>} : memref<8x2xf32, #tpu.memory_space<vmem>>, vector<8x2xf32>,
    return
  }
}

</mosaic_0001>

<bundles_post_ra>
// kernel: tpu_custom_call.1
= control target key start
LH: loop header
LB: loop body
LE: loop exit
PB: predicated region body
PF: predicated region fallthrough
CT: control target
= control target key end

     0   :  { %vm83_vm0 = vcmask 130048   ;;  %vm410_vm1 = vcmask 261120   ;;  %vm900_vm2 = vcmask 15360   ;;  %s1732_s1 = inlined_call_operand.vmem [shape: f32[16,256], index: 1, kind: input, shape index: {}]   ;;  %s1733_s2 = inlined_call_operand.vmem [shape: f32[32,16], index: 2, kind: input, shape index: {}]   ;;  %s1734_s0 = inlined_call_operand.vmem [shape: bf16[256,256], index: 0, kind: input, shape index: {}]   ;;  %s1735_s3 = inlined_call_operand.vmem [shape: f32[32,1], index: 3, kind: input, shape index: {}]   ;;  %s1736_s5 = inlined_call_operand.vmem [shape: f32[32,1], index: 5, kind: input, shape index: {}]   ;;  %s1737_s7 = inlined_call_operand.vmem [shape: f32[32,1], index: 7, kind: input, shape index: {}]   ;;  %s1738_s9 = inlined_call_operand.vmem [shape: f32[8,1], index: 9, kind: input, shape index: {}]   ;;  %s1739_s4 = inlined_call_operand.vmem [shape: f32[32,32], index: 4, kind: input, shape index: {}]   ;;  %s1740_s6 = inlined_call_operand.vmem [shape: f32[32,32], index: 6, kind: input, shape index: {}]   ;;  %s1741_s8 = inlined_call_operand.vmem [shape: f32[8,32], index: 8, kind: input, shape index: {}]   ;;  %s1742_s10 = inlined_call_operand.vmem [shape: f32[256,2], index: 10, kind: input, shape index: {}]   ;;  %s1743_s11 = inlined_call_operand.vmem [shape: f32[8,2], index: 11, kind: output, shape index: {}]  }
   0x1   :  { %v71_v0 = vld [vmem:[%s1732_s1] sm:$0xff]  ;;  %v73_v1 = vld [vmem:[%s1732_s1 + $0x10] sm:$0xff]  ;;  %v72_v2 = vld [vmem:[%s1732_s1 + $0x8] sm:$0xff] }
   0x2   :  { %v81_v3 = vpack.c.bf16 %v73_v1, %v71_v0  ;;  %v74_v4 = vld [vmem:[%s1732_s1 + $0x18] sm:$0xff]  ;;  %v75_v5 = vld [vmem:[%s1733_s2] sm:$0xff]  ;;  %v76_v6 = vld [vmem:[%s1733_s2 + $0x8] sm:$0xff] }
   0x3   :  { %v82_v7 = vpack.c.bf16 %v74_v4, %v72_v2  ;;  %v79_v8 = vpack.c.bf16 %v76_v6, %v75_v5  ;;  %v968_v9 = vld [vmem:[%s1734_s0 + $0x70] sm:$0xf]  ;;  %v1063_v10 = vld [vmem:[%s1734_s0 + $0x74] sm:$0xf0]  ;;  %v1062_v15 = vld [vmem:[%s1734_s0 + $0x74] sm:$0xf] }
   0x4   :  { %97 = vmatpush.bf16.msra.mxu0 %v81_v3  ;;  %v1032_v11 = vld [vmem:[%s1734_s0 + $0xf0] sm:$0xf]  ;;  %v1079_v12 = vld [vmem:[%s1734_s0 + $0xf4] sm:$0xf0]  ;;  %v1175_v13 = vor.u32 %v1063_v10, %v968_v9  ;;  %v970_v16 = vld [vmem:[%s1734_s0 + $0x78] sm:$0xf0] }
   0x5   :  { %116 = vmatpush.bf16.msra.mxu1 %v82_v7  ;;  %v1177_v14 = vor.u32 %v1079_v12, %v1032_v11  ;;  %v1078_v17 = vld [vmem:[%s1734_s0 + $0xf4] sm:$0xf]  ;;  %v1188_v18 = vor.u32 %v1062_v15, %v970_v16  ;;  %v1034_v19 = vld [vmem:[%s1734_s0 + $0xf8] sm:$0xf0]  ;;  %v960_v20 = vld [vmem:[%s1734_s0 + $0x60] sm:$0xf] }
   0x6   :  { %v1061_v21 = vld [vmem:[%s1734_s0 + $0x64] sm:$0xf0]  ;;  %316 = vmatpush.bf16.msra.mxu2 %v1175_v13  ;;  %v1201_v22 = vor.u32 %v1078_v17, %v1034_v19  ;;  %v1024_v24 = vld [vmem:[%s1734_s0 + $0xe0] sm:$0xf]  ;;  %v1060_v26 = vld [vmem:[%s1734_s0 + $0x64] sm:$0xf] }
   0x7   :  { %906 = vmatmul.msk.bf16.vlgmr.msra.gmra.mxu0 %vm83_vm0, %v79_v8  ;;  %v1203_v23 = vor.u32 %v1061_v21, %v960_v20  ;;  %v1077_v25 = vld [vmem:[%s1734_s0 + $0xe4] sm:$0xf0]  ;;  %335 = vmatpush.bf16.msra.mxu3 %v1177_v14  ;;  %v962_v28 = vld [vmem:[%s1734_s0 + $0x68] sm:$0xf0]  ;;  %v1076_v29 = vld [vmem:[%s1734_s0 + $0xe4] sm:$0xf] }
   0x8   :  { %908 = vmatmul.msk.bf16.vlgmr.msra.gmra.mxu1 %vm83_vm0, %v79_v8  ;;  %v1216_v27 = vor.u32 %v1077_v25, %v1024_v24  ;;  %v1026_v30 = vld [vmem:[%s1734_s0 + $0xe8] sm:$0xf0]  ;;  %354 = vmatpush.bf16.msrb.mxu0 %v1188_v18  ;;  %v1229_v31 = vor.u32 %v1060_v26, %v962_v28  ;;  %v952_v33 = vld [vmem:[%s1734_s0 + $0x50] sm:$0xf]  ;;  %v1059_v34 = vld [vmem:[%s1734_s0 + $0x54] sm:$0xf0] }
   0x9   :  { %373 = vmatpush.bf16.msrb.mxu1 %v1201_v22  ;;  %v1231_v32 = vor.u32 %v1076_v29, %v1026_v30  ;;  %v1016_v35 = vld [vmem:[%s1734_s0 + $0xd0] sm:$0xf]  ;;  %v1075_v36 = vld [vmem:[%s1734_s0 + $0xd4] sm:$0xf0]  ;;  %v1058_v37 = vld [vmem:[%s1734_s0 + $0x54] sm:$0xf]  ;;  %v1252_v39 = vor.u32 %v1059_v34, %v952_v33 }
   0xa   :  { %v954_v38 = vld [vmem:[%s1734_s0 + $0x58] sm:$0xf0]  ;;  %317 = vmatpush.bf16.msra.mxu2 %v1203_v23  ;;  %v1074_v40 = vld [vmem:[%s1734_s0 + $0xd4] sm:$0xf]  ;;  %v1261_v42 = vor.u32 %v1075_v36, %v1016_v35  ;;  %v944_v43 = vld [vmem:[%s1734_s0 + $0x40] sm:$0xf] }
   0xb   :  { %v1018_v41 = vld [vmem:[%s1734_s0 + $0xd8] sm:$0xf0]  ;;  %336 = vmatpush.bf16.msra.mxu3 %v1216_v27  ;;  %v1057_v44 = vld [vmem:[%s1734_s0 + $0x44] sm:$0xf0]  ;;  %v1271_v45 = vor.u32 %v1058_v37, %v954_v38  ;;  %v1008_v47 = vld [vmem:[%s1734_s0 + $0xc0] sm:$0xf] }
   0xc   :  { %355 = vmatpush.bf16.msrb.mxu0 %v1229_v31  ;;  %v1273_v46 = vor.u32 %v1074_v40, %v1018_v41  ;;  %v1073_v48 = vld [vmem:[%s1734_s0 + $0xc4] sm:$0xf0]  ;;  %v1056_v49 = vld [vmem:[%s1734_s0 + $0x44] sm:$0xf]  ;;  %v946_v50 = vld [vmem:[%s1734_s0 + $0x48] sm:$0xf0]  ;;  %v1297_v54 = vor.u32 %v1057_v44, %v944_v43 }
   0xd   :  { %374 = vmatpush.bf16.msrb.mxu1 %v1231_v32  ;;  %v1072_v51 = vld [vmem:[%s1734_s0 + $0xc4] sm:$0xf]  ;;  %v1010_v52 = vld [vmem:[%s1734_s0 + $0xc8] sm:$0xf0]  ;;  %v77_v53 = vld [vmem:[%s1733_s2 + $0x10] sm:$0xff]  ;;  %v1303_v56 = vor.u32 %v1073_v48, %v1008_v47  ;;  %v1313_v59 = vor.u32 %v1056_v49, %v946_v50 }
   0xe   :  { %318 = vmatpush.bf16.msra.mxu2 %v1252_v39  ;;  %v78_v55 = vld [vmem:[%s1733_s2 + $0x18] sm:$0xff]  ;;  %v936_v57 = vld [vmem:[%s1734_s0 + $0x30] sm:$0xf]  ;;  %v1315_v60 = vor.u32 %v1072_v51, %v1010_v52  ;;  %v1054_v63 = vld [vmem:[%s1734_s0 + $0x34] sm:$0xf] }
   0xf   :  { %337 = vmatpush.bf16.msra.mxu3 %v1261_v42  ;;  %v1055_v58 = vld [vmem:[%s1734_s0 + $0x34] sm:$0xf0]  ;;  %v1000_v61 = vld [vmem:[%s1734_s0 + $0xb0] sm:$0xf]  ;;  %v938_v0 = vld [vmem:[%s1734_s0 + $0x38] sm:$0xf0]  ;;  %v80_v3 = vpack.c.bf16 %v78_v55, %v77_v53 }
  0x10   :  { %356 = vmatpush.bf16.msrb.mxu0 %v1271_v45  ;;  %v1071_v62 = vld [vmem:[%s1734_s0 + $0xb4] sm:$0xf0]  ;;  %v1070_v1 = vld [vmem:[%s1734_s0 + $0xb4] sm:$0xf]  ;;  %v1002_v2 = vld [vmem:[%s1734_s0 + $0xb8] sm:$0xf0]  ;;  %v1336_v4 = vor.u32 %v1055_v58, %v936_v57  ;;  %v1343_v6 = vor.u32 %v1054_v63, %v938_v0 }
  0x11   :  { %375 = vmatpush.bf16.msrb.mxu1 %v1273_v46  ;;  %v1339_v5 = vor.u32 %v1071_v62, %v1000_v61  ;;  %v1345_v7 = vor.u32 %v1070_v1, %v1002_v2  ;;  %v928_v8 = vld [vmem:[%s1734_s0 + $0x20] sm:$0xf]  ;;  %v1053_v9 = vld [vmem:[%s1734_s0 + $0x24] sm:$0xf0]  ;;  %v1052_v15 = vld [vmem:[%s1734_s0 + $0x24] sm:$0xf] }
  0x12   :  { %319 = vmatpush.bf16.msra.mxu2 %v1297_v54  ;;  %v992_v10 = vld [vmem:[%s1734_s0 + $0xa0] sm:$0xf]  ;;  %v1362_v11 = vor.u32 %v1053_v9, %v928_v8  ;;  %v1069_v12 = vld [vmem:[%s1734_s0 + $0xa4] sm:$0xf0]  ;;  %v930_v16 = vld [vmem:[%s1734_s0 + $0x28] sm:$0xf0] }
  0x13   :  { %338 = vmatpush.bf16.msra.mxu3 %v1303_v56  ;;  %v1373_v17 = vor.u32 %v1069_v12, %v992_v10  ;;  %v1375_v19 = vor.u32 %v1052_v15, %v930_v16  ;;  %v1068_v20 = vld [vmem:[%s1734_s0 + $0xa4] sm:$0xf]  ;;  %v994_v21 = vld [vmem:[%s1734_s0 + $0xa8] sm:$0xf0]  ;;  %v920_v25 = vld [vmem:[%s1734_s0 + $0x10] sm:$0xf] }
  0x14   :  { %357 = vmatpush.bf16.msrb.mxu0 %v1313_v59  ;;  %1755 = vst [vmem:[#allocation2_spill] sm:$0xff] %v1362_v11  ;;  %v1384_v24 = vor.u32 %v1068_v20, %v994_v21  ;;  %v1051_v26 = vld [vmem:[%s1734_s0 + $0x14] sm:$0xf0]  ;;  %v984_v28 = vld [vmem:[%s1734_s0 + $0x90] sm:$0xf]  ;;  %v1084_v58 = vmov 0  }
  0x15   :  { %376 = vmatpush.bf16.msrb.mxu1 %v1315_v60  ;;  %1756 = vst [vmem:[#allocation3_spill] sm:$0xff] %v1373_v17  ;;  %v1397_v29 = vor.u32 %v1051_v26, %v920_v25  ;;  %v1067_v30 = vld [vmem:[%s1734_s0 + $0x94] sm:$0xf0]  ;;  %v1050_v33 = vld [vmem:[%s1734_s0 + $0x14] sm:$0xf]  ;;  %1081 = vset.pattern.permute.xlu0 %v1084_v58  ;;  %v132_v62 = vld [vmem:[%s1735_s3] sm:$0xff] }
  0x16   :  { %320 = vmatpush.bf16.msra.mxu2 %v1336_v4  ;;  %v922_v34 = vld [vmem:[%s1734_s0 + $0x18] sm:$0xf0]  ;;  %v1409_v35 = vor.u32 %v1067_v30, %v984_v28  ;;  %v1066_v37 = vld [vmem:[%s1734_s0 + $0x94] sm:$0xf]  ;;  %v912_v41 = vld [vmem:[%s1734_s0] sm:$0xf]  ;;  %1082 = vset.pattern.permute.xlu1 %v1084_v58 }
  0x17   :  { %907 = vmatmul.msk.bf16.gmra.mxu0 %vm83_vm0, %v80_v3  ;;  %339 = vmatpush.bf16.msra.mxu3 %v1339_v5  ;;  %1757 = vst [vmem:[#allocation4_spill] sm:$0xff] %v1397_v29  ;;  %v1411_v36 = vor.u32 %v1050_v33, %v922_v34  ;;  %v986_v38 = vld [vmem:[%s1734_s0 + $0x98] sm:$0xf0]  ;;  %v1049_v43 = vld [vmem:[%s1734_s0 + $0x4] sm:$0xf0]  ;;  %v134_v61 = vld [vmem:[%s1735_s3 + $0x10] sm:$0xff] }
  0x18   :  { %909 = vmatmul.msk.bf16.gmra.mxu1 %vm83_vm0, %v80_v3  ;;  %358 = vmatpush.bf16.msrb.mxu0 %v1343_v6  ;;  %1758 = vst [vmem:[#allocation5_spill] sm:$0xff] %v1409_v35  ;;  %v1419_v40 = vor.u32 %v1066_v37, %v986_v38  ;;  %v976_v44 = vld [vmem:[%s1734_s0 + $0x80] sm:$0xf]  ;;  %v1434_v47 = vor.u32 %v1049_v43, %v912_v41  ;;  %v1065_v48 = vld [vmem:[%s1734_s0 + $0x84] sm:$0xf0]  ;;  %v135_v63 = vld [vmem:[%s1735_s3 + $0x18] sm:$0xff] }
  0x19   :  { %377 = vmatpush.bf16.msrb.mxu1 %v1345_v7  ;;  %v1048_v49 = vld [vmem:[%s1734_s0 + $0x4] sm:$0xf]  ;;  %v914_v50 = vld [vmem:[%s1734_s0 + $0x8] sm:$0xf0]  ;;  %v1445_v51 = vor.u32 %v1065_v48, %v976_v44  ;;  %148 = vperm.xlu0 %1081, %v134_v61   ;;  %v628_v8 = vld [vmem:[%s1737_s7 + $0x18] sm:$0xff] }
  0x1a   :  { %321 = vmatpush.bf16.msra.mxu2 %v1362_v11  ;;  %1759 = vst [vmem:[#allocation6_spill] sm:$0xff] %v1434_v47  ;;  %v1447_v52 = vor.u32 %v1048_v49, %v914_v50  ;;  %v1064_v53 = vld [vmem:[%s1734_s0 + $0x84] sm:$0xf]  ;;  %v978_v55 = vld [vmem:[%s1734_s0 + $0x88] sm:$0xf0]  ;;  %1083 = vset.pattern.permute.xlu2 %v1084_v58 }
  0x1b   :  { %340 = vmatpush.bf16.msra.mxu3 %v1373_v17  ;;  %1760 = vst [vmem:[#allocation7_spill] sm:$0xff] %v1445_v51  ;;  %v1456_v57 = vor.u32 %v1064_v53, %v978_v55  ;;  %138 = vperm.xlu1 %1082, %v132_v62   ;;  %v459_v0 = vld [vmem:[%s1736_s5] sm:$0xff]  ;;  %v133_v1 = vld [vmem:[%s1735_s3 + $0x8] sm:$0xff] }
  0x1c   :  { %359 = vmatpush.bf16.msrb.mxu0 %v1375_v19  ;;  %v460_v9 = vld [vmem:[%s1736_s5 + $0x8] sm:$0xff]  ;;  %v770_v20 = vld [vmem:[%s1738_s9] sm:$0xff] }
  0x1d   :  { %378 = vmatpush.bf16.msrb.mxu1 %v1384_v24  ;;  %v625_v21 = vld [vmem:[%s1737_s7] sm:$0xff] }
  0x1e   :  { %322 = vmatpush.bf16.msra.mxu2 %v1397_v29 }
  0x1f   :  { %341 = vmatpush.bf16.msra.mxu3 %v1409_v35 }
  0x20   :  { %360 = vmatpush.bf16.msrb.mxu0 %v1411_v36 }
  0x21   :  { %379 = vmatpush.bf16.msrb.mxu1 %v1419_v40  ;;  %153 = vperm.xlu0 %1081, %v135_v63  }
  0x22   :  { %323 = vmatpush.bf16.msra.mxu2 %v1434_v47 }
  0x23   :  { %342 = vmatpush.bf16.msra.mxu3 %v1445_v51  ;;  %143 = vperm.xlu1 %1082, %v133_v1  }
  0x24   :  { %361 = vmatpush.bf16.msrb.mxu0 %v1447_v52 }
  0x25   :  { %380 = vmatpush.bf16.msrb.mxu1 %v1456_v57 }
  0x28   :  { %483 = vmatpush.bf16.msra.mxu0 %v1175_v13 }
  0x29   :  { %502 = vmatpush.bf16.msra.mxu1 %v1177_v14  ;;  %465 = vperm.xlu0 %1081, %v459_v0  }
  0x2b   :  { %470 = vperm.xlu1 %1082, %v460_v9  }
  0x2c   :  { %484 = vmatpush.bf16.msra.mxu0 %v1203_v23 }
  0x2d   :  { %503 = vmatpush.bf16.msra.mxu1 %v1216_v27 }
  0x30   :  { %485 = vmatpush.bf16.msra.mxu0 %v1252_v39 }
  0x31   :  { %504 = vmatpush.bf16.msra.mxu1 %v1261_v42  ;;  %646 = vperm.xlu0 %1081, %v628_v8  }
  0x33   :  { %631 = vperm.xlu1 %1082, %v625_v21  }
  0x34   :  { %486 = vmatpush.bf16.msra.mxu0 %v1297_v54 }
  0x35   :  { %505 = vmatpush.bf16.msra.mxu1 %v1303_v56 }
  0x38   :  { %487 = vmatpush.bf16.msra.mxu0 %v1336_v4 }
  0x39   :  { %506 = vmatpush.bf16.msra.mxu1 %v1339_v5  ;;  %773 = vperm.xlu0 %1081, %v770_v20  }
  0x3c   :  { %488 = vmatpush.bf16.msra.mxu0 %v1362_v11 }
  0x3d   :  { %507 = vmatpush.bf16.msra.mxu1 %v1373_v17 }
  0x40   :  { %489 = vmatpush.bf16.msra.mxu0 %v1397_v29 }
  0x41   :  { %508 = vmatpush.bf16.msra.mxu1 %v1409_v35 }
  0x44   :  { %490 = vmatpush.bf16.msra.mxu0 %v1434_v47 }
  0x45   :  { %509 = vmatpush.bf16.msra.mxu1 %v1445_v51 }
  0x84   :  { %v99_v2 = vpop.f32.mrf.mxu0 }
  0x85   :  { %v118_v3 = vpop.f32.mrf.mxu1 }
  0x8b   :  { %v149_v50 = vpop.permute.xlu0 %148 }
  0x8c   :  { %v101_v10 = vpop.f32.mrf.mxu0 }
  0x8d   :  { %v128_v12 = vpack.c.bf16 %v101_v10, %v99_v2  ;;  %v120_v15 = vpop.f32.mrf.mxu1  ;;  %v139_v49 = vpop.permute.xlu1 %138 }
  0x8e   :  { %v129_v16 = vpack.c.bf16 %v120_v15, %v118_v3 }
  0x8f   :  { %324 = vmatmul.bf16.vlgmr.msra.gmra.mxu2 %v128_v12  ;;  %362 = vmatmul.bf16.vlgmr.msrb.gmra.mxu0 %v128_v12 }
  0x90   :  { %343 = vmatmul.bf16.vlgmr.msra.gmra.mxu3 %v129_v16  ;;  %381 = vmatmul.bf16.vlgmr.msrb.gmra.mxu1 %v129_v16 }
  0x93   :  { %v154_v3 = vpop.permute.xlu0 %153 }
  0x94   :  { %v104_v25 = vpop.f32.mrf.mxu0 }
  0x95   :  { %v123_v26 = vpop.f32.mrf.mxu1  ;;  %v144_v62 = vpop.permute.xlu1 %143 }
  0x9c   :  { %v106_v28 = vpop.f32.mrf.mxu0 }
  0x9d   :  { %v130_v30 = vpack.c.bf16 %v106_v28, %v104_v25  ;;  %v125_v33 = vpop.f32.mrf.mxu1 }
  0x9e   :  { %v131_v34 = vpack.c.bf16 %v125_v33, %v123_v26 }
  0x9f   :  { %329 = vmatmul.bf16.gmra.mxu2 %v130_v30  ;;  %367 = vmatmul.bf16.gmra.mxu0 %v130_v30 }
  0xa0   :  { %348 = vmatmul.bf16.gmra.mxu3 %v131_v34  ;;  %386 = vmatmul.bf16.gmra.mxu1 %v131_v34 }
 0x10c   :  { %v363_v37 = vpop.f32.mrf.mxu0 }
 0x10d   :  { %v382_v38 = vpop.f32.mrf.mxu1  ;;  %v364_v9 = vadd.f32 %v363_v37, %v139_v49 }
 0x10f   :  { %v383_v25 = vadd.f32 %v382_v38, %v364_v9  ;;  %v401_v38 = vld [vmem:[%s1739_s4 + $0x8] sm:$0xff] }
 0x111   :  { %v393_v11 = vmax.f32 %v383_v25, 0.0 }
 0x112   :  { %v325_v41 = vpop.f32.mrf.mxu2 }
 0x113   :  { %v344_v43 = vpop.f32.mrf.mxu3  ;;  %v326_v33 = vadd.f32 %v325_v41, %v139_v49 }
 0x114   :  { %v365_v44 = vpop.f32.mrf.mxu0 }
 0x115   :  { %v384_v48 = vpop.f32.mrf.mxu1  ;;  %v366_v1 = vadd.f32 %v365_v44, %v144_v62 }
 0x117   :  { %v385_v16 = vadd.f32 %v384_v48, %v366_v1  ;;  %v400_v48 = vld [vmem:[%s1739_s4] sm:$0xff]  ;;  %v1764_v1 = vld [vmem:[#allocation4_spill] sm:$0xff] }
 0x119   :  { %v395_v47 = vmax.f32 %v385_v16, 0.0 }
 0x11a   :  { %v327_v53 = vpop.f32.mrf.mxu2 }
 0x11b   :  { %v346_v55 = vpop.f32.mrf.mxu3  ;;  %v328_v26 = vadd.f32 %v327_v53, %v144_v62  ;;  %v407_v53 = vpack.c.bf16 %v395_v47, %v393_v11  ;;  %v402_v11 = vld [vmem:[%s1739_s4 + $0x10] sm:$0xff] }
 0x11c   :  { %v368_v58 = vpop.f32.mrf.mxu0 }
 0x11d   :  { %v387_v61 = vpop.f32.mrf.mxu1  ;;  %v369_v63 = vadd.f32 %v368_v58, %v149_v50  ;;  %v347_v35 = vadd.f32 %v346_v55, %v328_v26  ;;  %v1762_v55 = vld [vmem:[#allocation2_spill] sm:$0xff] }
 0x11f   :  { %v388_v10 = vadd.f32 %v387_v61, %v369_v63  ;;  %v404_v61 = vpack.c.bf16 %v401_v38, %v400_v48  ;;  %v394_v62 = vmax.f32 %v347_v35, 0.0  ;;  %v403_v35 = vld [vmem:[%s1739_s4 + $0x18] sm:$0xff] }
 0x120   :  { %v405_v47 = vpack.c.bf16 %v403_v35, %v402_v11 }
 0x121   :  { %v397_v28 = vmax.f32 %v388_v10, 0.0  ;;  %v462_v10 = vld [vmem:[%s1736_s5 + $0x18] sm:$0xff] }
 0x122   :  { %v330_v0 = vpop.f32.mrf.mxu2 }
 0x123   :  { %v349_v2 = vpop.f32.mrf.mxu3  ;;  %v331_v20 = vadd.f32 %v330_v0, %v149_v50  ;;  %v345_v50 = vadd.f32 %v344_v43, %v326_v33  ;;  %v1761_v43 = vld [vmem:[#allocation5_spill] sm:$0xff]  ;;  %v1763_v0 = vld [vmem:[#allocation7_spill] sm:$0xff] }
 0x124   :  { %v370_v8 = vpop.f32.mrf.mxu0 }
 0x125   :  { %v371_v12 = vadd.f32 %v370_v8, %v154_v3  ;;  %v389_v15 = vpop.f32.mrf.mxu1  ;;  %v350_v58 = vadd.f32 %v349_v2, %v331_v20  ;;  %v1765_v2 = vld [vmem:[#allocation6_spill] sm:$0xff]  ;;  %v461_v8 = vld [vmem:[%s1736_s5 + $0x10] sm:$0xff] }
 0x126   :  { %475 = vperm.xlu2 %1083, %v461_v8  }
 0x127   :  { %v390_v21 = vadd.f32 %v389_v15, %v371_v12  ;;  %v396_v41 = vmax.f32 %v350_v58, 0.0 }
 0x129   :  { %v399_v30 = vmax.f32 %v390_v21, 0.0  ;;  %v627_v21 = vld [vmem:[%s1737_s7 + $0x10] sm:$0xff] }
 0x12a   :  { %v332_v34 = vpop.f32.mrf.mxu2 }
 0x12b   :  { %v333_v29 = vadd.f32 %v332_v34, %v154_v3  ;;  %v409_v44 = vpack.c.bf16 %v399_v30, %v397_v28  ;;  %v351_v51 = vpop.f32.mrf.mxu3  ;;  %v626_v28 = vld [vmem:[%s1737_s7 + $0x8] sm:$0xff] }
 0x12d   :  { %v352_v37 = vadd.f32 %v351_v51, %v333_v29  ;;  %442 = vmatpush.bf16.msrb.mxu3 %v409_v44  ;;  %v392_v29 = vmax.f32 %v345_v50, 0.0 }
 0x12e   :  { %480 = vperm.xlu2 %1083, %v462_v10  }
 0x12f   :  { %v398_v49 = vmax.f32 %v352_v37, 0.0  ;;  %v406_v51 = vpack.c.bf16 %v394_v62, %v392_v29  ;;  %v471_v29 = vpop.permute.xlu1 %470 }
 0x131   :  { %443 = vmatpush.bf16.msrb.mxu3 %v407_v53  ;;  %v408_v63 = vpack.c.bf16 %v398_v49, %v396_v41 }
 0x133   :  { %423 = vmatpush.bf16.msrb.mxu2 %v408_v63 }
 0x134   :  { %1040 = vmatmul.msk.bf16.vlgmr.msrb.gmra.mxu3 %vm410_vm1, %v404_v61 }
 0x135   :  { %540 = vmatpush.bf16.msra.mxu3 %v1201_v22 }
 0x136   :  { %641 = vperm.xlu2 %1083, %v627_v21  }
 0x137   :  { %424 = vmatpush.bf16.msrb.mxu2 %v406_v51 }
 0x139   :  { %541 = vmatpush.bf16.msra.mxu3 %v1231_v32 }
 0x13a   :  { %1038 = vmatmul.msk.bf16.vlgmr.msrb.gmra.mxu2 %vm410_vm1, %v404_v61 }
 0x13b   :  { %521 = vmatpush.bf16.msra.mxu2 %v1188_v18 }
 0x13d   :  { %542 = vmatpush.bf16.msra.mxu3 %v1273_v46 }
 0x13e   :  { %636 = vperm.xlu2 %1083, %v626_v28  }
 0x13f   :  { %522 = vmatpush.bf16.msra.mxu2 %v1229_v31 }
 0x141   :  { %543 = vmatpush.bf16.msra.mxu3 %v1315_v60 }
 0x143   :  { %523 = vmatpush.bf16.msra.mxu2 %v1271_v45 }
 0x144   :  { %1041 = vmatmul.msk.bf16.gmra.mxu3 %vm410_vm1, %v405_v47 }
 0x145   :  { %544 = vmatpush.bf16.msra.mxu3 %v1345_v7 }
 0x147   :  { %524 = vmatpush.bf16.msra.mxu2 %v1313_v59 }
 0x149   :  { %545 = vmatpush.bf16.msra.mxu3 %v1384_v24 }
 0x14a   :  { %1039 = vmatmul.msk.bf16.gmra.mxu2 %vm410_vm1, %v405_v47  ;;  %v466_v47 = vpop.permute.xlu0 %465 }
 0x14b   :  { %525 = vmatpush.bf16.msra.mxu2 %v1343_v6 }
 0x14d   :  { %546 = vmatpush.bf16.msra.mxu3 %v1419_v40 }
 0x14f   :  { %526 = vmatpush.bf16.msra.mxu2 %v1375_v19 }
 0x151   :  { %547 = vmatpush.bf16.msra.mxu3 %v1456_v57 }
 0x153   :  { %527 = vmatpush.bf16.msra.mxu2 %v1411_v36 }
 0x155   :  { %668 = vmatpush.bf16.msrb.mxu3 %v1177_v14 }
 0x157   :  { %528 = vmatpush.bf16.msra.mxu2 %v1447_v52 }
 0x159   :  { %669 = vmatpush.bf16.msrb.mxu3 %v1216_v27 }
 0x15b   :  { %649 = vmatpush.bf16.msrb.mxu2 %v1175_v13 }
 0x15d   :  { %670 = vmatpush.bf16.msrb.mxu3 %v1261_v42 }
 0x15f   :  { %650 = vmatpush.bf16.msrb.mxu2 %v1203_v23 }
 0x161   :  { %671 = vmatpush.bf16.msrb.mxu3 %v1303_v56 }
 0x163   :  { %651 = vmatpush.bf16.msrb.mxu2 %v1252_v39 }
 0x165   :  { %672 = vmatpush.bf16.msrb.mxu3 %v1339_v5 }
 0x167   :  { %652 = vmatpush.bf16.msrb.mxu2 %v1297_v54 }
 0x169   :  { %673 = vmatpush.bf16.msrb.mxu3 %v1373_v17 }
 0x16b   :  { %653 = vmatpush.bf16.msrb.mxu2 %v1336_v4 }
 0x16d   :  { %674 = vmatpush.bf16.msrb.mxu3 %v1761_v43 }
 0x16f   :  { %654 = vmatpush.bf16.msrb.mxu2 %v1762_v55 }
 0x171   :  { %675 = vmatpush.bf16.msrb.mxu3 %v1763_v0 }
 0x173   :  { %655 = vmatpush.bf16.msrb.mxu2 %v1764_v1 }
 0x177   :  { %656 = vmatpush.bf16.msrb.mxu2 %v1765_v2 }
 0x180   :  { %v476_v53 = vpop.permute.xlu2 %475 }
 0x188   :  { %v481_v8 = vpop.permute.xlu2 %480 }
 0x1b7   :  { %v445_v3 = vpop.f32.mrf.mxu3 }
 0x1bd   :  { %v426_v9 = vpop.f32.mrf.mxu2 }
 0x1bf   :  { %v447_v12 = vpop.f32.mrf.mxu3 }
 0x1c0   :  { %v456_v15 = vpack.c.bf16 %v447_v12, %v445_v3 }
 0x1c2   :  { %510 = vmatmul.bf16.vlgmr.msra.gmra.mxu1 %v456_v15  ;;  %548 = vmatmul.bf16.vlgmr.msra.gmra.mxu3 %v456_v15 }
 0x1c5   :  { %v428_v16 = vpop.f32.mrf.mxu2 }
 0x1c6   :  { %v455_v20 = vpack.c.bf16 %v428_v16, %v426_v9 }
 0x1c7   :  { %v450_v25 = vpop.f32.mrf.mxu3 }
 0x1c8   :  { %491 = vmatmul.bf16.vlgmr.msra.gmra.mxu0 %v455_v20  ;;  %529 = vmatmul.bf16.vlgmr.msra.gmra.mxu2 %v455_v20 }
 0x1cd   :  { %v431_v26 = vpop.f32.mrf.mxu2 }
 0x1cf   :  { %v452_v30 = vpop.f32.mrf.mxu3 }
 0x1d0   :  { %v458_v33 = vpack.c.bf16 %v452_v30, %v450_v25 }
 0x1d2   :  { %515 = vmatmul.bf16.gmra.mxu1 %v458_v33  ;;  %553 = vmatmul.bf16.gmra.mxu3 %v458_v33 }
 0x1d5   :  { %v433_v34 = vpop.f32.mrf.mxu2 }
 0x1d6   :  { %v457_v58 = vpack.c.bf16 %v433_v34, %v431_v26 }
 0x1d8   :  { %496 = vmatmul.bf16.gmra.mxu0 %v457_v58  ;;  %534 = vmatmul.bf16.gmra.mxu2 %v457_v58 }
 0x23f   :  { %v511_v44 = vpop.f32.mrf.mxu1 }
 0x245   :  { %v492_v37 = vpop.f32.mrf.mxu0  ;;  %v549_v48 = vpop.f32.mrf.mxu3 }
 0x246   :  { %v493_v10 = vadd.f32 %v492_v37, %v466_v47 }
 0x247   :  { %v513_v38 = vpop.f32.mrf.mxu1 }
 0x248   :  { %v512_v26 = vadd.f32 %v511_v44, %v493_v10  ;;  %v568_v44 = vld [vmem:[%s1740_s6 + $0x8] sm:$0xff] }
 0x24a   :  { %v559_v17 = vmax.f32 %v512_v26, 0.0  ;;  %v642_v26 = vpop.permute.xlu2 %641 }
 0x24b   :  { %v530_v50 = vpop.f32.mrf.mxu2 }
 0x24c   :  { %v531_v34 = vadd.f32 %v530_v50, %v466_v47 }
 0x24d   :  { %v494_v41 = vpop.f32.mrf.mxu0  ;;  %v551_v49 = vpop.f32.mrf.mxu3 }
 0x24e   :  { %v495_v3 = vadd.f32 %v494_v41, %v471_v29 }
 0x24f   :  { %v516_v62 = vpop.f32.mrf.mxu1 }
 0x250   :  { %v514_v20 = vadd.f32 %v513_v38, %v495_v3  ;;  %v567_v38 = vld [vmem:[%s1740_s6] sm:$0xff] }
 0x253   :  { %v532_v61 = vpop.f32.mrf.mxu2 }
 0x254   :  { %v533_v28 = vadd.f32 %v532_v61, %v471_v29  ;;  %v571_v29 = vpack.c.bf16 %v568_v44, %v567_v38 }
 0x255   :  { %v497_v63 = vpop.f32.mrf.mxu0  ;;  %v554_v11 = vpop.f32.mrf.mxu3 }
 0x256   :  { %v498_v51 = vadd.f32 %v497_v63, %v476_v53  ;;  %v561_v63 = vmax.f32 %v514_v20, 0.0  ;;  %v552_v1 = vadd.f32 %v551_v49, %v533_v28 }
 0x257   :  { %v518_v16 = vpop.f32.mrf.mxu1 }
 0x258   :  { %v517_v12 = vadd.f32 %v516_v62, %v498_v51  ;;  %v573_v62 = vpack.c.bf16 %v561_v63, %v559_v17  ;;  %v562_v51 = vmax.f32 %v552_v1, 0.0  ;;  %v569_v17 = vld [vmem:[%s1740_s6 + $0x10] sm:$0xff] }
 0x25a   :  { %v563_v30 = vmax.f32 %v517_v12, 0.0 }
 0x25b   :  { %v535_v35 = vpop.f32.mrf.mxu2 }
 0x25c   :  { %v536_v21 = vadd.f32 %v535_v35, %v476_v53  ;;  %v550_v53 = vadd.f32 %v549_v48, %v531_v34 }
 0x25d   :  { %v499_v9 = vpop.f32.mrf.mxu0  ;;  %v556_v41 = vpop.f32.mrf.mxu3 }
 0x25e   :  { %v500_v15 = vadd.f32 %v499_v9, %v481_v8  ;;  %v555_v0 = vadd.f32 %v554_v11, %v536_v21 }
 0x260   :  { %v519_v25 = vadd.f32 %v518_v16, %v500_v15  ;;  %v564_v50 = vmax.f32 %v555_v0, 0.0  ;;  %v570_v0 = vld [vmem:[%s1740_s6 + $0x18] sm:$0xff] }
 0x261   :  { %v572_v1 = vpack.c.bf16 %v570_v0, %v569_v17 }
 0x262   :  { %v565_v33 = vmax.f32 %v519_v25, 0.0 }
 0x263   :  { %v537_v58 = vpop.f32.mrf.mxu2 }
 0x264   :  { %v575_v43 = vpack.c.bf16 %v565_v33, %v563_v30  ;;  %v538_v2 = vadd.f32 %v537_v58, %v481_v8  ;;  %v647_v58 = vpop.permute.xlu0 %646 }
 0x266   :  { %v557_v37 = vadd.f32 %v556_v41, %v538_v2  ;;  %589 = vmatpush.bf16.msrb.mxu0 %v575_v43  ;;  %v560_v2 = vmax.f32 %v550_v53, 0.0  ;;  %v637_v41 = vpop.permute.xlu2 %636 }
 0x268   :  { %v566_v61 = vmax.f32 %v557_v37, 0.0  ;;  %v574_v43 = vpack.c.bf16 %v562_v51, %v560_v2 }
 0x26a   :  { %v576_v11 = vpack.c.bf16 %v566_v61, %v564_v50  ;;  %590 = vmatpush.bf16.msrb.mxu0 %v573_v62  ;;  %v632_v50 = vpop.permute.xlu1 %631 }
 0x26c   :  { %608 = vmatpush.bf16.msrb.mxu1 %v576_v11 }
 0x26d   :  { %1042 = vmatmul.msk.bf16.vlgmr.msrb.gmra.mxu0 %vm410_vm1, %v571_v29 }
 0x26e   :  { %687 = vmatpush.bf16.msra.mxu0 %v1188_v18 }
 0x270   :  { %609 = vmatpush.bf16.msrb.mxu1 %v574_v43 }
 0x272   :  { %688 = vmatpush.bf16.msra.mxu0 %v1229_v31 }
 0x273   :  { %1044 = vmatmul.msk.bf16.vlgmr.msrb.gmra.mxu1 %vm410_vm1, %v571_v29 }
 0x274   :  { %706 = vmatpush.bf16.msra.mxu1 %v1201_v22 }
 0x276   :  { %689 = vmatpush.bf16.msra.mxu0 %v1271_v45 }
 0x278   :  { %707 = vmatpush.bf16.msra.mxu1 %v1231_v32 }
 0x27a   :  { %690 = vmatpush.bf16.msra.mxu0 %v1313_v59 }
 0x27c   :  { %708 = vmatpush.bf16.msra.mxu1 %v1273_v46 }
 0x27d   :  { %1043 = vmatmul.msk.bf16.gmra.mxu0 %vm410_vm1, %v572_v1 }
 0x27e   :  { %691 = vmatpush.bf16.msra.mxu0 %v1343_v6 }
 0x280   :  { %709 = vmatpush.bf16.msra.mxu1 %v1315_v60 }
 0x282   :  { %692 = vmatpush.bf16.msra.mxu0 %v1375_v19 }
 0x283   :  { %1045 = vmatmul.msk.bf16.gmra.mxu1 %vm410_vm1, %v572_v1 }
 0x284   :  { %710 = vmatpush.bf16.msra.mxu1 %v1345_v7 }
 0x286   :  { %693 = vmatpush.bf16.msra.mxu0 %v1411_v36 }
 0x288   :  { %711 = vmatpush.bf16.msra.mxu1 %v1384_v24 }
 0x28a   :  { %694 = vmatpush.bf16.msra.mxu0 %v1447_v52 }
 0x28c   :  { %712 = vmatpush.bf16.msra.mxu1 %v1419_v40 }
 0x28e   :  { %776 = vmatpush.bf16.msrb.mxu0 %v1175_v13  ;;  %v1766_v13 = vld [vmem:[#allocation4_spill] sm:$0xff] }
 0x290   :  { %713 = vmatpush.bf16.msra.mxu1 %v1456_v57 }
 0x292   :  { %777 = vmatpush.bf16.msrb.mxu0 %v1203_v23  ;;  %v1767_v23 = vld [vmem:[#allocation3_spill] sm:$0xff] }
 0x294   :  { %789 = vmatpush.bf16.msrb.mxu1 %v1177_v14  ;;  %v1768_v14 = vld [vmem:[#allocation6_spill] sm:$0xff] }
 0x296   :  { %778 = vmatpush.bf16.msrb.mxu0 %v1252_v39  ;;  %v1769_v39 = vld [vmem:[#allocation5_spill] sm:$0xff] }
 0x298   :  { %790 = vmatpush.bf16.msrb.mxu1 %v1216_v27  ;;  %v1770_v27 = vld [vmem:[#allocation7_spill] sm:$0xff] }
 0x29a   :  { %779 = vmatpush.bf16.msrb.mxu0 %v1297_v54 }
 0x29c   :  { %791 = vmatpush.bf16.msrb.mxu1 %v1261_v42 }
 0x29e   :  { %780 = vmatpush.bf16.msrb.mxu0 %v1336_v4 }
 0x2a0   :  { %792 = vmatpush.bf16.msrb.mxu1 %v1303_v56 }
 0x2a2   :  { %781 = vmatpush.bf16.msrb.mxu0 %v1762_v55 }
 0x2a4   :  { %793 = vmatpush.bf16.msrb.mxu1 %v1339_v5 }
 0x2a6   :  { %782 = vmatpush.bf16.msrb.mxu0 %v1766_v13 }
 0x2a8   :  { %794 = vmatpush.bf16.msrb.mxu1 %v1767_v23 }
 0x2aa   :  { %783 = vmatpush.bf16.msrb.mxu0 %v1768_v14 }
 0x2ac   :  { %795 = vmatpush.bf16.msrb.mxu1 %v1769_v39 }
 0x2b0   :  { %796 = vmatpush.bf16.msrb.mxu1 %v1770_v27 }
 0x2ea   :  { %v592_v54 = vpop.f32.mrf.mxu0 }
 0x2f0   :  { %v611_v42 = vpop.f32.mrf.mxu1 }
 0x2f2   :  { %v594_v48 = vpop.f32.mrf.mxu0 }
 0x2f3   :  { %v621_v4 = vpack.c.bf16 %v594_v48, %v592_v54 }
 0x2f5   :  { %657 = vmatmul.bf16.vlgmr.msrb.gmra.mxu2 %v621_v4  ;;  %695 = vmatmul.bf16.vlgmr.msra.gmra.mxu0 %v621_v4 }
 0x2f8   :  { %v613_v56 = vpop.f32.mrf.mxu1 }
 0x2f9   :  { %v622_v55 = vpack.c.bf16 %v613_v56, %v611_v42  ;;  %v733_v56 = vld [vmem:[%s1741_s8] sm:$0xff] }
 0x2fa   :  { %v597_v49 = vpop.f32.mrf.mxu0 }
 0x2fb   :  { %676 = vmatmul.bf16.vlgmr.msrb.gmra.mxu3 %v622_v55  ;;  %714 = vmatmul.bf16.vlgmr.msra.gmra.mxu1 %v622_v55 }
 0x300   :  { %v616_v5 = vpop.f32.mrf.mxu1 }
 0x302   :  { %v599_v35 = vpop.f32.mrf.mxu0 }
 0x303   :  { %v623_v47 = vpack.c.bf16 %v599_v35, %v597_v49 }
 0x305   :  { %662 = vmatmul.bf16.gmra.mxu2 %v623_v47  ;;  %700 = vmatmul.bf16.gmra.mxu0 %v623_v47  ;;  %v734_v47 = vpack.c.bf16 %v733_v56, %v733_v56 }
 0x308   :  { %v618_v3 = vpop.f32.mrf.mxu1 }
 0x309   :  { %v624_v8 = vpack.c.bf16 %v618_v3, %v616_v5 }
 0x30b   :  { %681 = vmatmul.bf16.gmra.mxu3 %v624_v8  ;;  %719 = vmatmul.bf16.gmra.mxu1 %v624_v8 }
 0x372   :  { %v696_v9 = vpop.f32.mrf.mxu0 }
 0x373   :  { %v697_v62 = vadd.f32 %v696_v9, %v632_v50 }
 0x378   :  { %v658_v10 = vpop.f32.mrf.mxu2  ;;  %v715_v12 = vpop.f32.mrf.mxu1 }
 0x379   :  { %v716_v2 = vadd.f32 %v715_v12, %v697_v62  ;;  %v659_v54 = vadd.f32 %v658_v10, %v632_v50  ;;  %v835_v12 = vld [vmem:[%s1742_s10 + $0x38] sm:$0xff]  ;;  %v845_v62 = vld [vmem:[%s1742_s10 + $0x88] sm:$0xff] }
 0x37a   :  { %v698_v15 = vpop.f32.mrf.mxu0  ;;  %v847_v50 = vld [vmem:[%s1742_s10 + $0x98] sm:$0xff] }
 0x37b   :  { %v699_v38 = vadd.f32 %v698_v15, %v637_v41  ;;  %v726_v42 = vmax.f32 %v716_v2, 0.0  ;;  %v851_v15 = vld [vmem:[%s1742_s10 + $0xb8] sm:$0xff] }
 0x37e   :  { %v677_v16 = vpop.f32.mrf.mxu3 }
 0x37f   :  { %v678_v55 = vadd.f32 %v677_v16, %v659_v54  ;;  %v834_v16 = vld [vmem:[%s1742_s10 + $0x30] sm:$0xff] }
 0x380   :  { %v660_v20 = vpop.f32.mrf.mxu2  ;;  %v717_v21 = vpop.f32.mrf.mxu1 }
 0x381   :  { %v718_v29 = vadd.f32 %v717_v21, %v699_v38  ;;  %v661_v1 = vadd.f32 %v660_v20, %v637_v41  ;;  %v725_v9 = vmax.f32 %v678_v55, 0.0  ;;  %v850_v20 = vld [vmem:[%s1742_s10 + $0xb0] sm:$0xff]  ;;  %v829_v38 = vld [vmem:[%s1742_s10 + $0x8] sm:$0xff] }
 0x382   :  { %v701_v25 = vpop.f32.mrf.mxu0  ;;  %v830_v41 = vld [vmem:[%s1742_s10 + $0x10] sm:$0xff] }
 0x383   :  { %v702_v63 = vadd.f32 %v701_v25, %v642_v26  ;;  %v728_v13 = vmax.f32 %v718_v29, 0.0  ;;  %v844_v29 = vld [vmem:[%s1742_s10 + $0x80] sm:$0xff] }
 0x385   :  { %v736_v49 = vpack.c.bf16 %v728_v13, %v726_v42 }
 0x386   :  { %v679_v28 = vpop.f32.mrf.mxu3 }
 0x387   :  { %v680_v48 = vadd.f32 %v679_v28, %v661_v1  ;;  %v832_v28 = vld [vmem:[%s1742_s10 + $0x20] sm:$0xff] }
 0x388   :  { %v663_v30 = vpop.f32.mrf.mxu2  ;;  %v720_v33 = vpop.f32.mrf.mxu1 }
 0x389   :  { %v721_v44 = vadd.f32 %v720_v33, %v702_v63  ;;  %v664_v43 = vadd.f32 %v663_v30, %v642_v26  ;;  %v727_v3 = vmax.f32 %v680_v48, 0.0  ;;  %v833_v26 = vld [vmem:[%s1742_s10 + $0x28] sm:$0xff]  ;;  %v831_v30 = vld [vmem:[%s1742_s10 + $0x18] sm:$0xff] }
 0x38a   :  { %v703_v34 = vpop.f32.mrf.mxu0 }
 0x38b   :  { %v704_v53 = vadd.f32 %v703_v34, %v647_v58  ;;  %v730_v17 = vmax.f32 %v721_v44, 0.0  ;;  %v735_v10 = vpack.c.bf16 %v727_v3, %v725_v9  ;;  %v848_v44 = vld [vmem:[%s1742_s10 + $0xa0] sm:$0xff] }
 0x38e   :  { %v682_v37 = vpop.f32.mrf.mxu3 }
 0x38f   :  { %v683_v23 = vadd.f32 %v682_v37, %v664_v43  ;;  %v849_v37 = vld [vmem:[%s1742_s10 + $0xa8] sm:$0xff] }
 0x390   :  { %v722_v61 = vpop.f32.mrf.mxu1  ;;  %v665_v11 = vpop.f32.mrf.mxu2 }
 0x391   :  { %v723_v51 = vadd.f32 %v722_v61, %v704_v53  ;;  %v666_v14 = vadd.f32 %v665_v11, %v647_v58  ;;  %v729_v5 = vmax.f32 %v683_v23, 0.0  ;;  %v828_v53 = vld [vmem:[%s1742_s10] sm:$0xff]  ;;  %v846_v61 = vld [vmem:[%s1742_s10 + $0x90] sm:$0xff]  ;;  %v774_v11 = vpop.permute.xlu0 %773 }
 0x393   :  { %v732_v0 = vmax.f32 %v723_v51, 0.0 }
 0x395   :  { %v738_v39 = vpack.c.bf16 %v732_v0, %v730_v17 }
 0x396   :  { %v684_v27 = vpop.f32.mrf.mxu3 }
 0x397   :  { %v685_v4 = vadd.f32 %v684_v27, %v666_v14  ;;  %761 = vmatpush.bf16.msra.mxu3 %v738_v39 }
 0x399   :  { %v731_v35 = vmax.f32 %v685_v4, 0.0 }
 0x39b   :  { %v737_v8 = vpack.c.bf16 %v731_v35, %v729_v5  ;;  %762 = vmatpush.bf16.msra.mxu3 %v736_v49 }
 0x39d   :  { %748 = vmatpush.bf16.msra.mxu2 %v737_v8 }
 0x39e   :  { %1047 = vmatmul.msk.bf16.vlgmr.msra.gmra.mxu3 %vm410_vm1, %v734_v47 }
 0x39f   :  { %815 = vmatpush.bf16.msrb.mxu3 %v1201_v22  ;;  %v842_v22 = vld [vmem:[%s1742_s10 + $0x70] sm:$0xff] }
 0x3a1   :  { %749 = vmatpush.bf16.msra.mxu2 %v735_v10 }
 0x3a3   :  { %816 = vmatpush.bf16.msrb.mxu3 %v1231_v32  ;;  %v841_v32 = vld [vmem:[%s1742_s10 + $0x68] sm:$0xff] }
 0x3a4   :  { %1046 = vmatmul.msk.bf16.vlgmr.msra.gmra.mxu2 %vm410_vm1, %v734_v47 }
 0x3a5   :  { %802 = vmatpush.bf16.msrb.mxu2 %v1188_v18  ;;  %v843_v18 = vld [vmem:[%s1742_s10 + $0x78] sm:$0xff] }
 0x3a6   :  { %860 = vmatpush.msra.mxu0 %v843_v18 }
 0x3a7   :  { %817 = vmatpush.bf16.msrb.mxu3 %v1273_v46  ;;  %v857_v46 = vld [vmem:[%s1742_s10 + $0xe8] sm:$0xff] }
 0x3a8   :  { %861 = vmatpush.msra.mxu0 %v842_v22 }
 0x3a9   :  { %803 = vmatpush.bf16.msrb.mxu2 %v1229_v31  ;;  %v859_v31 = vld [vmem:[%s1742_s10 + $0xf8] sm:$0xff] }
 0x3aa   :  { %880 = vmatpush.msra.mxu1 %v859_v31  ;;  %862 = vmatpush.msra.mxu0 %v841_v32 }
 0x3ab   :  { %818 = vmatpush.bf16.msrb.mxu3 %v1315_v60  ;;  %v856_v60 = vld [vmem:[%s1742_s10 + $0xe0] sm:$0xff] }
 0x3ad   :  { %804 = vmatpush.bf16.msrb.mxu2 %v1271_v45  ;;  %v858_v45 = vld [vmem:[%s1742_s10 + $0xf0] sm:$0xff] }
 0x3ae   :  { %881 = vmatpush.msra.mxu1 %v858_v45 }
 0x3af   :  { %819 = vmatpush.bf16.msrb.mxu3 %v1345_v7  ;;  %v855_v7 = vld [vmem:[%s1742_s10 + $0xd8] sm:$0xff] }
 0x3b0   :  { %882 = vmatpush.msra.mxu1 %v857_v46 }
 0x3b1   :  { %805 = vmatpush.bf16.msrb.mxu2 %v1313_v59  ;;  %v840_v59 = vld [vmem:[%s1742_s10 + $0x60] sm:$0xff] }
 0x3b2   :  { %863 = vmatpush.msra.mxu0 %v840_v59  ;;  %883 = vmatpush.msra.mxu1 %v856_v60 }
 0x3b3   :  { %820 = vmatpush.bf16.msrb.mxu3 %v1384_v24  ;;  %v854_v24 = vld [vmem:[%s1742_s10 + $0xd0] sm:$0xff] }
 0x3b4   :  { %884 = vmatpush.msra.mxu1 %v855_v7 }
 0x3b5   :  { %806 = vmatpush.bf16.msrb.mxu2 %v1343_v6  ;;  %v839_v6 = vld [vmem:[%s1742_s10 + $0x58] sm:$0xff] }
 0x3b6   :  { %864 = vmatpush.msra.mxu0 %v839_v6  ;;  %885 = vmatpush.msra.mxu1 %v854_v24 }
 0x3b7   :  { %821 = vmatpush.bf16.msrb.mxu3 %v1419_v40  ;;  %v853_v40 = vld [vmem:[%s1742_s10 + $0xc8] sm:$0xff] }
 0x3b8   :  { %886 = vmatpush.msra.mxu1 %v853_v40 }
 0x3b9   :  { %807 = vmatpush.bf16.msrb.mxu2 %v1375_v19  ;;  %v838_v19 = vld [vmem:[%s1742_s10 + $0x50] sm:$0xff] }
 0x3ba   :  { %865 = vmatpush.msra.mxu0 %v838_v19 }
 0x3bb   :  { %822 = vmatpush.bf16.msrb.mxu3 %v1456_v57  ;;  %v852_v57 = vld [vmem:[%s1742_s10 + $0xc0] sm:$0xff] }
 0x3bc   :  { %887 = vmatpush.msra.mxu1 %v852_v57 }
 0x3bd   :  { %808 = vmatpush.bf16.msrb.mxu2 %v1411_v36  ;;  %v837_v36 = vld [vmem:[%s1742_s10 + $0x48] sm:$0xff] }
 0x3be   :  { %866 = vmatpush.msra.mxu0 %v837_v36  ;;  %888 = vmatpush.msra.mxu1 %v851_v15 }
 0x3c0   :  { %889 = vmatpush.msra.mxu1 %v850_v20 }
 0x3c1   :  { %809 = vmatpush.bf16.msrb.mxu2 %v1447_v52  ;;  %v836_v52 = vld [vmem:[%s1742_s10 + $0x40] sm:$0xff] }
 0x3c2   :  { %867 = vmatpush.msra.mxu0 %v836_v52  ;;  %890 = vmatpush.msra.mxu1 %v849_v37 }
 0x3c4   :  { %868 = vmatpush.msra.mxu0 %v835_v12  ;;  %891 = vmatpush.msra.mxu1 %v848_v44 }
 0x3c6   :  { %869 = vmatpush.msra.mxu0 %v834_v16  ;;  %892 = vmatpush.msra.mxu1 %v847_v50 }
 0x3c8   :  { %870 = vmatpush.msra.mxu0 %v833_v26  ;;  %893 = vmatpush.msra.mxu1 %v846_v61 }
 0x3ca   :  { %871 = vmatpush.msra.mxu0 %v832_v28  ;;  %894 = vmatpush.msra.mxu1 %v845_v62 }
 0x3cc   :  { %872 = vmatpush.msra.mxu0 %v831_v30  ;;  %895 = vmatpush.msra.mxu1 %v844_v29 }
 0x3ce   :  { %873 = vmatpush.msra.mxu0 %v830_v41 }
 0x3d0   :  { %874 = vmatpush.msra.mxu0 %v829_v38 }
 0x3d2   :  { %875 = vmatpush.msra.mxu0 %v828_v53 }
 0x421   :  { %v764_v21 = vpop.f32.mrf.mxu3 }
 0x422   :  { %v769_v25 = vpack.c.bf16 %v764_v21, %v764_v21 }
 0x424   :  { %797 = vmatmul.bf16.vlgmr.msrb.gmra.mxu1 %v769_v25  ;;  %823 = vmatmul.bf16.vlgmr.msrb.gmra.mxu3 %v769_v25 }
 0x427   :  { %v751_v33 = vpop.f32.mrf.mxu2 }
 0x428   :  { %v768_v34 = vpack.c.bf16 %v751_v33, %v751_v33 }
 0x429   :  { %v766_v58 = vpop.f32.mrf.mxu3 }
 0x42a   :  { %784 = vmatmul.bf16.vlgmr.msrb.gmra.mxu0 %v768_v34  ;;  %810 = vmatmul.bf16.vlgmr.msrb.gmra.mxu2 %v768_v34 }
 0x42f   :  { %v753_v63 = vpop.f32.mrf.mxu2 }
 0x4a1   :  { %v798_v51 = vpop.f32.mrf.mxu1 }
 0x4a7   :  { %v785_v2 = vpop.f32.mrf.mxu0  ;;  %v824_v43 = vpop.f32.mrf.mxu3 }
 0x4a8   :  { %v786_v17 = vadd.f32 %v785_v2, %v774_v11 }
 0x4a9   :  { %v800_v0 = vpop.f32.mrf.mxu1 }
 0x4aa   :  { %v799_v1 = vadd.f32 %v798_v51, %v786_v17 }
 0x4ac   :  { %876 = vmatmul.f32.vlgmr.msra.gmra.mxu0 %v799_v1 }
 0x4ad   :  { %v811_v13 = vpop.f32.mrf.mxu2 }
 0x4ae   :  { %v812_v23 = vadd.f32 %v811_v13, %v774_v11 }
 0x4af   :  { %v787_v14 = vpop.f32.mrf.mxu0  ;;  %v826_v39 = vpop.f32.mrf.mxu3 }
 0x4b0   :  { %v825_v27 = vadd.f32 %v824_v43, %v812_v23 }
 0x4b2   :  { %896 = vmatmul.f32.vlgmr.msra.gmra.mxu1 %v825_v27 }
 0x4b5   :  { %v813_v54 = vpop.f32.mrf.mxu2 }
 0x529   :  { %v877_v42 = vpop.f32.mrf.mxu0 }
 0x52f   :  { %v897_v48 = vpop.f32.mrf.mxu1 }
 0x530   :  { %v898_v4 = vadd.f32 %v897_v48, %v877_v42 }
 0x532   :  { %901 = vst.msk [vmem:[%s1743_s11] sm:$0xff] %vm900_vm2, %v898_v4 }

</bundles_post_ra>
